<compile_context>
chip_gen: v7x
topology: tpu7x:2x2x1
jax: 0.10.0
libtpu: 0.0.40
codegen_flags: <defaults>
</compile_context>

<pallas_src>
import functools

import jax
import jax.numpy as jnp
from jax import lax
from jax.experimental import pallas as pl
from jax.experimental.pallas import tpu as pltpu


def _wsconv2d_kernel(x_ref, w_ref, b_ref, o_ref, *, KH, KW, stride, tap_accumulate):
    # x_ref: (Nb, Hp, Wp, Cin)          zero-padded NHWC block of Nb images
    # w_ref: (KH, KW*Cin, Cout_p)       scale-folded, im2col-flattened weights
    # b_ref: (1, Cout_p)                bias
    # o_ref: (Nb, Ho, Wo, Cout_p)       output block
    Nb, _, _, Cin = x_ref.shape
    _, H_out, W_out, Cout_p = o_ref.shape
    M = Nb * H_out * W_out

    x = x_ref[...]

    def tap(kh, kw):
        # Strided window of x for kernel tap (kh, kw): (Nb, Ho, Wo, Cin).
        return lax.slice(
            x,
            start_indices=(0, kh, kw, 0),
            limit_indices=(Nb,
                           kh + (H_out - 1) * stride + 1,
                           kw + (W_out - 1) * stride + 1,
                           Cin),
            strides=(1, stride, stride, 1),
        )

    acc = jnp.zeros((M, Cout_p), jnp.float32)
    for kh in range(KH):
        w_row = w_ref[kh]                                       # (KW*Cin, Cout_p)
        if tap_accumulate:
            # Large Cin: each tap already fills the MXU contraction depth; skip
            # the lane concatenate and accumulate one small matmul per tap.
            for kw in range(KW):
                lhs = tap(kh, kw).reshape(M, Cin)
                acc = acc + jnp.dot(lhs, w_row[kw * Cin:(kw + 1) * Cin, :],
                                    preferred_element_type=jnp.float32)
        else:
            # Small Cin: concatenate only the KW taps (KW-x expansion of one kh
            # row) so the matmul contraction depth is KW*Cin instead of Cin.
            row = jnp.concatenate([tap(kh, kw) for kw in range(KW)], axis=-1)
            acc = acc + jnp.dot(row.reshape(M, KW * Cin), w_row,
                                preferred_element_type=jnp.float32)

    acc = acc + b_ref[...].astype(jnp.float32)                  # broadcast over rows
    o_ref[...] = acc.reshape(Nb, H_out, W_out, Cout_p).astype(o_ref.dtype)


def _pick_batch_block(N, Hp, Wp, Cin, H_out, W_out, Cout_p, KW, itemsize,
                      tap_accumulate):
    """Largest Nb that (a) fits a conservative per-step VMEM budget,
    (b) leaves >= 2 grid steps (both v7x TensorCores busy), (c) divides N."""
    patches_width = Cin if tap_accumulate else KW * Cin
    per_img = (2 * Hp * Wp * Cin * itemsize            # x block, double-buffered
               + 2 * H_out * W_out * Cout_p * itemsize  # out block, double-buffered
               + H_out * W_out * patches_width * 4      # one kh-row of patches (f32)
               + H_out * W_out * Cout_p * 4)            # f32 accumulator
    budget = 12 * 1024 * 1024  # safely inside default scoped VMEM on v5e/v6e/v7x
    nb = max(1, budget // max(per_img, 1))
    nb = int(min(nb, max(1, N // 2), N))
    while N % nb != 0:          # avoid ragged last block
        nb -= 1
    return nb


def wsconv2d(x_nchw, weight_oihw, bias, *, stride=1, padding=1, compute_dtype=None):
    """Forward pass of WSConv2d. x_nchw: (N, Cin, H, W). Returns (N, Cout, Ho, Wo)."""
    N, Cin, H, W = x_nchw.shape
    Cout, Cin_w, KH, KW = weight_oihw.shape
    assert Cin_w == Cin
    scale = (2.0 / (Cin * KH * KW)) ** 0.5

    out_dtype = x_nchw.dtype
    compute_dtype = out_dtype if compute_dtype is None else compute_dtype

    H_out = (H + 2 * padding - KH) // stride + 1
    W_out = (W + 2 * padding - KW) // stride + 1
    Hp, Wp = H + 2 * padding, W + 2 * padding

    LANES = 128
    # Lane-dense HBM output only when it is actually >= one vreg wide; never pad
    # a tiny Cout (e.g. 8) up to 128 in HBM.
    Cout_p = ((Cout + LANES - 1) // LANES) * LANES if Cout >= LANES else Cout

    # Large-Cin path skips the lane concatenate (per-tap matmuls already have
    # full MXU contraction depth).
    tap_accumulate = Cin >= 128

    # NCHW -> NHWC + halo zero-pad (see TODO above about hoisting this out).
    x_nhwc = jnp.transpose(x_nchw, (0, 2, 3, 1)).astype(compute_dtype)
    x_pad = jnp.pad(x_nhwc, ((0, 0), (padding, padding), (padding, padding), (0, 0)))

    # Fold the WS scale into the weights in f32, lay out as (KH, KW*Cin, Cout_p)
    # matching the in-kernel patch layout (channels minor inside each kw tap).
    w_hwio = jnp.transpose(weight_oihw, (2, 3, 1, 0)).astype(jnp.float32) * scale
    w3d = w_hwio.reshape(KH, KW * Cin, Cout)
    w3d = jnp.pad(w3d, ((0, 0), (0, 0), (0, Cout_p - Cout))).astype(compute_dtype)
    b2d = jnp.pad(bias.astype(jnp.float32).reshape(1, Cout),
                  ((0, 0), (0, Cout_p - Cout)))

    Nb = _pick_batch_block(N, Hp, Wp, Cin, H_out, W_out, Cout_p, KW,
                           jnp.dtype(compute_dtype).itemsize, tap_accumulate)
    grid = (N // Nb,)

    kernel = functools.partial(_wsconv2d_kernel, KH=KH, KW=KW, stride=stride,
                               tap_accumulate=tap_accumulate)

    out_nhwc = pl.pallas_call(
        kernel,
        out_shape=jax.ShapeDtypeStruct((N, H_out, W_out, Cout_p), out_dtype),
        grid=grid,
        in_specs=[
            # Nb padded images per grid step.
            pl.BlockSpec((Nb, Hp, Wp, Cin), lambda n: (n, 0, 0, 0)),
            # Weights / bias: same block every step -> resident in VMEM.
            pl.BlockSpec((KH, KW * Cin, Cout_p), lambda n: (0, 0, 0)),
            pl.BlockSpec((1, Cout_p), lambda n: (0, 0)),
        ],
        out_specs=pl.BlockSpec((Nb, H_out, W_out, Cout_p), lambda n: (n, 0, 0, 0)),
        compiler_params=pltpu.CompilerParams(
            # Batch blocks are independent -> shard across v7x's two TensorCores.
            dimension_semantics=("parallel",),
        ),
    )(x_pad, w3d, b2d)

    if Cout_p != Cout:
        out_nhwc = out_nhwc[..., :Cout]
    return jnp.transpose(out_nhwc, (0, 3, 1, 2))  # back to NCHW


def _reference(x_nchw, weight_oihw, bias, *, stride=1, padding=1):
    Cin, KH, KW = weight_oihw.shape[1], weight_oihw.shape[2], weight_oihw.shape[3]
    scale = (2.0 / (Cin * KH * KW)) ** 0.5
    y = lax.conv_general_dilated(
        x_nchw * scale, weight_oihw,
        window_strides=(stride, stride),
        padding=((padding, padding), (padding, padding)),
        dimension_numbers=("NCHW", "OIHW", "NCHW"),
    )
    return y + bias.reshape(1, -1, 1, 1)


if __name__ == "__main__":
    key = jax.random.PRNGKey(0)
    kx, kw = jax.random.split(key)

    # Small shapes consistent with the module: N=2, Cin=4, Cout=8, 16x16 spatial.
    N, Cin, Cout, H, W = 2, 4, 8, 16, 16
    KH = KW = 3

    x = jax.random.normal(kx, (N, Cin, H, W), dtype=jnp.float32)
    # nn.init.normal_(self.conv.weight): standard normal; bias zeros.
    weight = jax.random.normal(kw, (Cout, Cin, KH, KW), dtype=jnp.float32)
    bias = jnp.zeros((Cout,), dtype=jnp.float32)

    out = wsconv2d(x, weight, bias, stride=1, padding=1)
    out = jax.block_until_ready(out)

    ref = _reference(x, weight, bias, stride=1, padding=1)
    assert out.shape == (N, Cout, H, W), out.shape
    assert jnp.allclose(out, ref, atol=1e-4, rtol=1e-4), float(jnp.max(jnp.abs(out - ref)))

    print("KERNEL_OK")
</pallas_src>

<mosaic_0001>
module attributes {stable_mosaic.version = 11 : i64} {
  func.func @_wsconv2d_kernel(%arg0: i32, %arg1: memref<1x18x18x4xf32, #tpu.memory_space<vmem>>, %arg2: memref<3x12x8xf32, #tpu.memory_space<vmem>>, %arg3: memref<1x8xf32, #tpu.memory_space<vmem>>, %arg4: memref<1x16x16x8xf32, #tpu.memory_space<vmem>>) attributes {dimension_semantics = [#tpu.dimension_semantics<parallel>], iteration_bounds = array<i64: 2>, scalar_prefetch = 0 : i64, scratch_operands = 0 : i64, tpu.core_type = #tpu.core_type<tc>, window_params = [{transform_indices = @transform_0, window_bounds = array<i64: 1, 18, 18, 4>}, {pipeline_mode = #tpu.pipeline_mode<synchronous>, transform_indices = @transform_1, window_bounds = array<i64: 3, 12, 8>}, {pipeline_mode = #tpu.pipeline_mode<synchronous>, transform_indices = @transform_2, window_bounds = array<i64: 1, 8>}, {transform_indices = @transform_3, window_bounds = array<i64: 1, 16, 16, 8>}]} {
    %c0 = arith.constant 0 : index
    %c0_0 = arith.constant 0 : index
    %c0_1 = arith.constant 0 : index
    %c0_2 = arith.constant 0 : index
    %0 = vector.load %arg1[%c0, %c0_0, %c0_1, %c0_2] : memref<1x18x18x4xf32, #tpu.memory_space<vmem>>, vector<1x18x18x4xf32>
    %cst = arith.constant 0.000000e+00 : f32
    %1 = vector.broadcast %cst : f32 to vector<256x8xf32>
    %c0_3 = arith.constant 0 : index
    %c0_4 = arith.constant 0 : index
    %c0_5 = arith.constant 0 : index
    %2 = vector.load %arg2[%c0_3, %c0_4, %c0_5] : memref<3x12x8xf32, #tpu.memory_space<vmem>>, vector<1x12x8xf32>
    %3 = vector.shape_cast %2 : vector<1x12x8xf32> to vector<12x8xf32>
    %4 = vector.extract_strided_slice %0 {offsets = [0, 0, 0, 0], sizes = [1, 16, 16, 4], strides = [1, 1, 1, 1]} : vector<1x18x18x4xf32> to vector<1x16x16x4xf32>
    %5 = vector.extract_strided_slice %0 {offsets = [0, 0, 1, 0], sizes = [1, 16, 16, 4], strides = [1, 1, 1, 1]} : vector<1x18x18x4xf32> to vector<1x16x16x4xf32>
    %6 = vector.extract_strided_slice %0 {offsets = [0, 0, 2, 0], sizes = [1, 16, 16, 4], strides = [1, 1, 1, 1]} : vector<1x18x18x4xf32> to vector<1x16x16x4xf32>
    %7 = tpu.concatenate %4, %5, %6 in 3 : vector<1x16x16x4xf32>, vector<1x16x16x4xf32>, vector<1x16x16x4xf32> -> vector<1x16x16x12xf32>
    %8 = vector.shape_cast %7 : vector<1x16x16x12xf32> to vector<256x12xf32>
    %cst_6 = arith.constant dense<0.000000e+00> : vector<256x8xf32>
    %9 = tpu.matmul %8, %3, %cst_6 {dimension_numbers = #tpu.dot_dimension_numbers<[1], [0], [0], [1], [0, 0, 1, 1], [], []>} : vector<256x12xf32>, vector<12x8xf32>, vector<256x8xf32> -> vector<256x8xf32>
    %10 = arith.addf %1, %9 : vector<256x8xf32>
    %c1 = arith.constant 1 : index
    %c0_7 = arith.constant 0 : index
    %c0_8 = arith.constant 0 : index
    %11 = vector.load %arg2[%c1, %c0_7, %c0_8] : memref<3x12x8xf32, #tpu.memory_space<vmem>>, vector<1x12x8xf32>
    %12 = vector.shape_cast %11 : vector<1x12x8xf32> to vector<12x8xf32>
    %13 = vector.extract_strided_slice %0 {offsets = [0, 1, 0, 0], sizes = [1, 16, 16, 4], strides = [1, 1, 1, 1]} : vector<1x18x18x4xf32> to vector<1x16x16x4xf32>
    %14 = vector.extract_strided_slice %0 {offsets = [0, 1, 1, 0], sizes = [1, 16, 16, 4], strides = [1, 1, 1, 1]} : vector<1x18x18x4xf32> to vector<1x16x16x4xf32>
    %15 = vector.extract_strided_slice %0 {offsets = [0, 1, 2, 0], sizes = [1, 16, 16, 4], strides = [1, 1, 1, 1]} : vector<1x18x18x4xf32> to vector<1x16x16x4xf32>
    %16 = tpu.concatenate %13, %14, %15 in 3 : vector<1x16x16x4xf32>, vector<1x16x16x4xf32>, vector<1x16x16x4xf32> -> vector<1x16x16x12xf32>
    %17 = vector.shape_cast %16 : vector<1x16x16x12xf32> to vector<256x12xf32>
    %cst_9 = arith.constant dense<0.000000e+00> : vector<256x8xf32>
    %18 = tpu.matmul %17, %12, %cst_9 {dimension_numbers = #tpu.dot_dimension_numbers<[1], [0], [0], [1], [0, 0, 1, 1], [], []>} : vector<256x12xf32>, vector<12x8xf32>, vector<256x8xf32> -> vector<256x8xf32>
    %19 = arith.addf %10, %18 : vector<256x8xf32>
    %c2 = arith.constant 2 : index
    %c0_10 = arith.constant 0 : index
    %c0_11 = arith.constant 0 : index
    %20 = vector.load %arg2[%c2, %c0_10, %c0_11] : memref<3x12x8xf32, #tpu.memory_space<vmem>>, vector<1x12x8xf32>
    %21 = vector.shape_cast %20 : vector<1x12x8xf32> to vector<12x8xf32>
    %22 = vector.extract_strided_slice %0 {offsets = [0, 2, 0, 0], sizes = [1, 16, 16, 4], strides = [1, 1, 1, 1]} : vector<1x18x18x4xf32> to vector<1x16x16x4xf32>
    %23 = vector.extract_strided_slice %0 {offsets = [0, 2, 1, 0], sizes = [1, 16, 16, 4], strides = [1, 1, 1, 1]} : vector<1x18x18x4xf32> to vector<1x16x16x4xf32>
    %24 = vector.extract_strided_slice %0 {offsets = [0, 2, 2, 0], sizes = [1, 16, 16, 4], strides = [1, 1, 1, 1]} : vector<1x18x18x4xf32> to vector<1x16x16x4xf32>
    %25 = tpu.concatenate %22, %23, %24 in 3 : vector<1x16x16x4xf32>, vector<1x16x16x4xf32>, vector<1x16x16x4xf32> -> vector<1x16x16x12xf32>
    %26 = vector.shape_cast %25 : vector<1x16x16x12xf32> to vector<256x12xf32>
    %cst_12 = arith.constant dense<0.000000e+00> : vector<256x8xf32>
    %27 = tpu.matmul %26, %21, %cst_12 {dimension_numbers = #tpu.dot_dimension_numbers<[1], [0], [0], [1], [0, 0, 1, 1], [], []>} : vector<256x12xf32>, vector<12x8xf32>, vector<256x8xf32> -> vector<256x8xf32>
    %28 = arith.addf %19, %27 : vector<256x8xf32>
    %c0_13 = arith.constant 0 : index
    %c0_14 = arith.constant 0 : index
    %29 = vector.load %arg3[%c0_13, %c0_14] : memref<1x8xf32, #tpu.memory_space<vmem>>, vector<1x8xf32>
    %30 = vector.broadcast %29 : vector<1x8xf32> to vector<256x8xf32>
    %31 = arith.addf %28, %30 : vector<256x8xf32>
    %32 = vector.shape_cast %31 : vector<256x8xf32> to vector<1x16x16x8xf32>
    %c0_15 = arith.constant 0 : index
    %c0_16 = arith.constant 0 : index
    %c0_17 = arith.constant 0 : index
    %c0_18 = arith.constant 0 : index
    %33 = vector.load %arg4[%c0_15, %c0_16, %c0_17, %c0_18] : memref<1x16x16x8xf32, #tpu.memory_space<vmem>>, vector<1x16x16x8xf32>
    tpu.vector_store %arg4[%c0_15, %c0_16, %c0_17, %c0_18], %32 {strides = array<i32>} : memref<1x16x16x8xf32, #tpu.memory_space<vmem>>, vector<1x16x16x8xf32>,
    return
  }
  func.func @transform_0(%arg0: i32) -> (i32, i32, i32, i32) {
    %c0_i32 = arith.constant 0 : i32
    %c0_i32_0 = arith.constant 0 : i32
    %c0_i32_1 = arith.constant 0 : i32
    %c0_i32_2 = arith.constant 0 : i32
    return %arg0, %c0_i32, %c0_i32_0, %c0_i32_1 : i32, i32, i32, i32
  }
  func.func @transform_1(%arg0: i32) -> (i32, i32, i32) {
    %c0_i32 = arith.constant 0 : i32
    %c0_i32_0 = arith.constant 0 : i32
    %c0_i32_1 = arith.constant 0 : i32
    %c0_i32_2 = arith.constant 0 : i32
    return %c0_i32, %c0_i32_0, %c0_i32_1 : i32, i32, i32
  }
  func.func @transform_2(%arg0: i32) -> (i32, i32) {
    %c0_i32 = arith.constant 0 : i32
    %c0_i32_0 = arith.constant 0 : i32
    %c0_i32_1 = arith.constant 0 : i32
    return %c0_i32, %c0_i32_0 : i32, i32
  }
  func.func @transform_3(%arg0: i32) -> (i32, i32, i32, i32) {
    %c0_i32 = arith.constant 0 : i32
    %c0_i32_0 = arith.constant 0 : i32
    %c0_i32_1 = arith.constant 0 : i32
    %c0_i32_2 = arith.constant 0 : i32
    return %arg0, %c0_i32, %c0_i32_0, %c0_i32_1 : i32, i32, i32, i32
  }
}

</mosaic_0001>

<bundles_post_ra>
// kernel: tpu_custom_call.1
= control target key start
LH: loop header
LB: loop body
LE: loop exit
PB: predicated region body
PF: predicated region fallthrough
CT: control target
= control target key end

     0   :  { %s2211_s12 = smov 0   ;;  %s3146_s0 = inlined_call_operand.vmem [shape: f32[2,18,18,4], index: 0, kind: input, shape index: {}]   ;;  %s3147_s1 = inlined_call_operand.vmem [shape: f32[3,12,8], index: 1, kind: input, shape index: {}]   ;;  %s3148_s2 = inlined_call_operand.vmem [shape: f32[1,8], index: 2, kind: input, shape index: {}]   ;;  %s3149_s3 = inlined_call_operand.vmem [shape: f32[2,16,16,8], index: 3, kind: output, shape index: {}]  }
   0x1 LB: > { %s1711_s13 = sadd.s32 4294967295, %s2186_s12   ;;  %p1715_p0 = scmp.ge.s32.totalorder %s2186_s12, 1  ;;  %s2186_s12 = sphi %s2211_s12, %s13_s12  }
   0x2   : > { %p137_p1 = scmp.lt.s32.totalorder %s2186_s12, 3 }
   0x4   : > { %p138_p2 = pnand %p1715_p0, %p137_p1 }
   0x5   : > { %p161_p3 = scmp.lt.s32.totalorder (!%p138_p2), %s1711_s13, 1  ;;  %v1719_v0 = vld [vmem:[%s3147_s1 + $0x10] sm:$0xff] (!%p138_p2)  ;;  %v1720_v1 = vld [vmem:[%s3147_s1 + $0x18] sm:$0xf] (!%p138_p2)  ;;  %v225_v2 = vld [vmem:[%s3147_s1] sm:$0xff] (!%p138_p2)  ;;  %vm824_vm0 = vcmask (!%p138_p2), 1043456  }
   0x6   : > { %141 = sbr.rel (%p138_p2) target bundleno = 520 (0x208), region = 32  ;;  %v2084_v3 = vpack.c.bf16 (!%p138_p2), %v1720_v1, %v1719_v0  ;;  %v226_v4 = vld [vmem:[%s3147_s1 + $0x8] sm:$0xf] (!%p138_p2)  ;;  %vm2188_vm1 = vmmov (!%p138_p2), 1   ;;  %vm275_vm3 = vcmask (!%p138_p2), 1046528   ;;  %s2189_s26 = smov (!%p138_p2), 4  }
   0x7   : > { %vm2239_vm2 = vmpackc.low (!%p138_p2), %vm824_vm0, %vm2188_vm1  ;;  %v2243_v6 = vpack.c.bf16 (!%p138_p2), %v226_v4, %v225_v2  ;;  %vm452_vm4 = vcmask (!%p138_p2), 1045504   ;;  %s2190_s27 = smov (!%p138_p2), 8   ;;  %vm629_vm5 = vcmask (!%p138_p2), 31744   ;;  %vm662_vm6 = vcmask (!%p138_p2), 64512  }
   0x8   : > { %2086 = vmatprep.subr.msk.bf16.mxu1 (!%p138_p2), %vm2239_vm2, %v2084_v3  ;;  %vm727_vm7 = vcmask (!%p138_p2), 97280  }
   0x9   : > { %2092 = vmatprep.subr.msk.bf16.mxu0 (!%p138_p2), %vm2239_vm2, %v2243_v6  ;;  %2089 = vmatpush3.bf16.msk.msra.mxu1 (!%p138_p2), %vm2239_vm2, %v2084_v3 }
   0xa   : > { %2095 = vmatpush3.bf16.msk.msra.mxu0 (!%p138_p2), %vm2239_vm2, %v2243_v6  ;;  %2102 = vmatprep.subr.msk.bf16.mxu1 (!%p138_p2), %vm2239_vm2, %v2243_v6 }
   0xd   : > { %s3187_s13 = smov (!%p161_p3, %s1711_s13), 1 }
   0xe   : > { %s2168_s14 = smul.u32 432, %s3187_s13  ;;  %s1825_s5 = sshll.u32 %s3187_s13, 8 }
   0xf   : > { %s3045_s10 = scalar_lea.vmem %s3149_s3, %s1825_s5 }
  0x10   : > { %s2237_s25 = scalar_lea.vmem %s3146_s0, %s2168_s14 }
  0x11   : > { %v2246_v7 = vld [vmem:[%s2237_s25 + $0x8] sm:$0xff]  ;;  %v173_v8 = vld [vmem:[%s2237_s25 + $0x10] sm:$0x3]  ;;  %v2250_v9 = vld [vmem:[%s2237_s25] sm:$0xff] }
  0x12   : > { %v277_v10 = vrot.slane %v2246_v7, 1  ;;  %v279_v11 = vrot.slane %v173_v8, 1  ;;  %v276_v12 = vrot.slane %v2250_v9, 1  ;;  %v2257_v13 = vld [vmem:[%s2237_s25 + $0x20] sm:$0xff]  ;;  %v176_v14 = vld [vmem:[%s2237_s25 + $0x28] sm:$0x3] }
  0x13   : > { %v282_v15 = vrot.slane %v2257_v13, 1  ;;  %v284_v16 = vrot.slane %v176_v14, 1  ;;  %v2267_v17 = vld [vmem:[%s2237_s25 + $0x18] sm:$0xff]  ;;  %v459_v21 = vrot.slane %v2257_v13, 2  ;;  %v453_v22 = vrot.slane %v2250_v9, 2  ;;  %v2295_v33 = vld [vmem:[%s2237_s25 + $0x30] sm:$0xff] }
  0x14   : > { %v280_v18 = vsel %vm275_vm3, %v277_v10, %v279_v11  ;;  %v278_v19 = vsel %vm275_vm3, %v276_v12, %v277_v10  ;;  %v281_v20 = vrot.slane %v2267_v17, 1  ;;  %v458_v25 = vrot.slane %v2267_v17, 2  ;;  %v2291_v31 = vld [vmem:[%s2237_s25 + $0x38] sm:$0xff]  ;;  %v179_v32 = vld [vmem:[%s2237_s25 + $0x40] sm:$0x3]  ;;  %v2307_v40 = vld [vmem:[%s2237_s25 + $0x50] sm:$0xff] }
  0x15   : > { %358 = vrot.lane.b32.xlu1 %v280_v18, %s2189_s26  ;;  %356 = vrot.lane.b32.xlu0 %v278_v19, %s2189_s26  ;;  %v285_v23 = vsel %vm275_vm3, %v282_v15, %v284_v16  ;;  %v454_v26 = vrot.slane %v2246_v7, 2  ;;  %v461_v29 = vrot.slane %v176_v14, 2  ;;  %v456_v30 = vrot.slane %v173_v8, 2  ;;  %v182_v45 = vld [vmem:[%s2237_s25 + $0x58] sm:$0x3]  ;;  %v2314_v46 = vld [vmem:[%s2237_s25 + $0xc8] sm:$0xff] }
  0x16   : > { %v283_v24 = vsel %vm275_vm3, %v281_v20, %v282_v15  ;;  %v460_v27 = vsel %vm452_vm4, %v458_v25, %v459_v21  ;;  %v287_v34 = vrot.slane %v2291_v31, 1  ;;  %v289_v35 = vrot.slane %v179_v32, 1  ;;  %v2317_v47 = vld [vmem:[%s2237_s25 + $0x48] sm:$0xff]  ;;  %v2320_v48 = vld [vmem:[%s2237_s25 + $0xd0] sm:$0x3]  ;;  %v2323_v49 = vld [vmem:[%s2237_s25 + $0xe0] sm:$0xff] }
  0x17   : > { %v455_v28 = vsel %vm452_vm4, %v453_v22, %v454_v26  ;;  %v462_v36 = vsel %vm452_vm4, %v459_v21, %v461_v29  ;;  %v457_v37 = vsel %vm452_vm4, %v454_v26, %v456_v30  ;;  %v286_v38 = vrot.slane %v2295_v33, 1  ;;  %v200_v53 = vld [vmem:[%s2237_s25 + $0xe8] sm:$0x3]  ;;  %v2336_v59 = vld [vmem:[%s2237_s25 + $0xf8] sm:$0xff]  ;;  %v203_v1 = vld [vmem:[%s2237_s25 + $0x100] sm:$0x3] }
  0x18   : > { %v290_v39 = vsel %vm275_vm3, %v287_v34, %v289_v35  ;;  %v464_v42 = vrot.slane %v2291_v31, 2  ;;  %v466_v43 = vrot.slane %v179_v32, 2  ;;  %v463_v44 = vrot.slane %v2295_v33, 2  ;;  %v2340_v62 = vld [vmem:[%s2237_s25 + $0x68] sm:$0xff]  ;;  %v2352_v3 = vld [vmem:[%s2237_s25 + $0x70] sm:$0x3] }
  0x19   : > { %362 = vrot.lane.b32.xlu1 %v285_v23, %s2189_s26  ;;  %360 = vrot.lane.b32.xlu0 %v283_v24, %s2189_s26  ;;  %v288_v41 = vsel %vm275_vm3, %v286_v38, %v287_v34  ;;  %v292_v50 = vrot.slane %v2307_v40, 1  ;;  %v294_v51 = vrot.slane %v182_v45, 1  ;;  %v317_v52 = vrot.slane %v2314_v46, 1  ;;  %v2356_v10 = vld [vmem:[%s2237_s25 + $0x110] sm:$0xff]  ;;  %v2361_v14 = vld [vmem:[%s2237_s25 + $0x60] sm:$0xff] }
  0x1a   : > { %v467_v54 = vsel %vm452_vm4, %v464_v42, %v466_v43  ;;  %v465_v55 = vsel %vm452_vm4, %v463_v44, %v464_v42  ;;  %v291_v56 = vrot.slane %v2317_v47, 1  ;;  %v319_v57 = vrot.slane %v2320_v48, 1  ;;  %v206_v18 = vld [vmem:[%s2237_s25 + $0x118] sm:$0x3]  ;;  %v2380_v26 = vld [vmem:[%s2237_s25 + $0x128] sm:$0xff]  ;;  %v2400_v38 = vld [vmem:[%s2237_s25 + $0x140] sm:$0xff] }
  0x1b   : > { %v322_v58 = vrot.slane %v2323_v49, 1  ;;  %v469_v60 = vrot.slane %v2307_v40, 2  ;;  %v471_v61 = vrot.slane %v182_v45, 2  ;;  %v324_v0 = vrot.slane %v200_v53, 1  ;;  %v209_v32 = vld [vmem:[%s2237_s25 + $0x130] sm:$0x3] }
  0x1c   : > { %v2345_v63 = vsel %vm275_vm3, %v317_v52, %v319_v57  ;;  %v295_v2 = vsel %vm275_vm3, %v292_v50, %v294_v51  ;;  %v3165_v4 = vrot.slane %v2323_v49, 2  ;;  %v501_v8 = vrot.slane %v200_v53, 2  ;;  %v212_v42 = vld [vmem:[%s2237_s25 + $0x148] sm:$0x3] }
  0x1d   : > { %537 = vrot.lane.b32.xlu1 %v460_v27, %s2190_s27  ;;  %533 = vrot.lane.b32.xlu0 %v455_v28, %s2190_s27  ;;  %v293_v11 = vsel %vm275_vm3, %v291_v56, %v292_v50  ;;  %v468_v12 = vrot.slane %v2317_v47, 2  ;;  %v2366_v15 = vsel %vm275_vm3, %v322_v58, %v324_v0  ;;  %v3162_v16 = vrot.slane %v2336_v59, 1  ;;  %v2411_v44 = vld [vmem:[%s2237_s25 + $0x88] sm:$0x3] }
  0x1e   : > { %v2373_v19 = vsel %vm452_vm4, %v3165_v4, %v501_v8  ;;  %v329_v20 = vrot.slane %v203_v1, 1  ;;  %v3159_v21 = vrot.slane %v2336_v59, 2  ;;  %v472_v22 = vsel %vm452_vm4, %v469_v60, %v471_v61  ;;  %v215_v8 = vld [vmem:[%s2237_s25 + $0x160] sm:$0x3]  ;;  %v2555_v4 = vld [vmem:[%s2237_s25 + $0xa8] sm:$0xff] }
  0x1f   : > { %v297_v23 = vrot.slane %v2340_v62, 1  ;;  %v506_v24 = vrot.slane %v203_v1, 2  ;;  %v3158_v25 = vrot.slane %v2356_v10, 1  ;;  %v299_v27 = vrot.slane %v2352_v3, 1  ;;  %v2433_v1 = vld [vmem:[%s2237_s25 + $0x78] sm:$0xff] }
  0x20   : > { %v296_v28 = vrot.slane %v2361_v14, 1  ;;  %v2389_v29 = vsel %vm275_vm3, %v3162_v16, %v329_v20  ;;  %v334_v30 = vrot.slane %v206_v18, 1  ;;  %v470_v34 = vsel %vm452_vm4, %v468_v12, %v469_v60  ;;  %v2428_v60 = vld [vmem:[%s2237_s25 + $0x158] sm:$0xff]  ;;  %v2448_v20 = vld [vmem:[%s2237_s25 + $0x170] sm:$0xff] }
  0x21   : > { %539 = vrot.lane.b32.xlu1 %v462_v36, %s2190_s27  ;;  %535 = vrot.lane.b32.xlu0 %v457_v37, %s2190_s27  ;;  %v2396_v35 = vsel %vm452_vm4, %v3159_v21, %v506_v24  ;;  %v3156_v36 = vrot.slane %v2356_v10, 2  ;;  %v511_v37 = vrot.slane %v206_v18, 2  ;;  %v474_v43 = vrot.slane %v2340_v62, 2 }
  0x22   : > { %v339_v50 = vrot.slane %v209_v32, 1  ;;  %v3152_v51 = vrot.slane %v2380_v26, 2  ;;  %v476_v53 = vrot.slane %v2352_v3, 2  ;;  %v516_v56 = vrot.slane %v209_v32, 2 }
  0x23   : > { %v2416_v45 = vsel %vm452_vm4, %v3156_v36, %v511_v37  ;;  %v3151_v57 = vrot.slane %v2400_v38, 1  ;;  %v300_v61 = vsel %vm275_vm3, %v297_v23, %v299_v27  ;;  %v298_v0 = vsel %vm275_vm3, %v296_v28, %v297_v23  ;;  %v218_v28 = vld [vmem:[%s2237_s25 + $0x178] sm:$0x3]  ;;  %v191_v36 = vld [vmem:[%s2237_s25 + $0xa0] sm:$0x3] }
  0x24   : > { %v344_v3 = vrot.slane %v212_v42, 1  ;;  %v3150_v12 = vrot.slane %v2400_v38, 2  ;;  %v521_v18 = vrot.slane %v212_v42, 2  ;;  %v304_v23 = vrot.slane %v2411_v44, 1 }
  0x25   : > { %366 = vrot.lane.b32.xlu1 %v290_v39, %s2189_s26  ;;  %364 = vrot.lane.b32.xlu0 %v288_v41, %s2189_s26  ;;  %v2405_v39 = vsel %vm275_vm3, %v3158_v25, %v334_v30  ;;  %v3155_v41 = vrot.slane %v2380_v26, 1  ;;  %v3153_v27 = vrot.slane %v2428_v60, 1  ;;  %v301_v30 = vrot.slane %v2433_v1, 1 }
  0x26   : > { %v2455_v24 = vsel %vm275_vm3, %v3151_v57, %v344_v3  ;;  %v2465_v32 = vsel %vm452_vm4, %v3150_v12, %v521_v18  ;;  %v3154_v37 = vrot.slane %v2428_v60, 2  ;;  %v477_v42 = vsel %vm452_vm4, %v474_v43, %v476_v53  ;;  %v2472_v3 = vld [vmem:[%s2237_s25 + $0x188] sm:$0xff]  ;;  %v221_v57 = vld [vmem:[%s2237_s25 + $0x190] sm:$0x3] }
  0x27   : > { %v354_v12 = vrot.slane %v218_v28, 1  ;;  %v481_v53 = vrot.slane %v2411_v44, 2 }
  0x29   : > { %543 = vrot.lane.b32.xlu1 %v467_v54, %s2190_s27  ;;  %541 = vrot.lane.b32.xlu0 %v465_v55, %s2190_s27  ;;  %v473_v54 = vrot.slane %v2361_v14, 2  ;;  %v2424_v55 = vld [vmem:[%s2237_s25 + $0x80] sm:$0xff] }
  0x2d   : > { %370 = vrot.lane.b32.xlu1 %v295_v2, %s2189_s26  ;;  %368 = vrot.lane.b32.xlu0 %v293_v11, %s2189_s26  ;;  %v2438_v2 = vsel %vm275_vm3, %v3155_v41, %v339_v50  ;;  %v2444_v11 = vsel %vm452_vm4, %v3152_v51, %v516_v56  ;;  %v475_v50 = vsel %vm452_vm4, %v473_v54, %v474_v43  ;;  %v526_v56 = vrot.slane %v215_v8, 2  ;;  %v2483_v43 = vld [vmem:[%s2237_s25 + $0x98] sm:$0xff]  ;;  %v224_v41 = vld [vmem:[%s2237_s25 + $0x1a8] sm:$0x3] }
  0x2e   : > { %v531_v51 = vrot.slane %v218_v28, 2  ;;  %v478_v28 = vrot.slane %v2433_v1, 2  ;;  %v1296_v21 = vrot.slane %v224_v41, 1 }
  0x2f   : > { %v2488_v54 = vsel %vm452_vm4, %v3154_v37, %v526_v56  ;;  %v3161_v56 = vrot.slane %v2472_v3, 1  ;;  %v2502_v37 = vld [vmem:[%s2237_s25 + $0x1a0] sm:$0xff] }
  0x30   : > { %v3164_v25 = vrot.slane %v2502_v37, 1 }
  0x31   : > { %547 = vrot.lane.b32.xlu1 %v472_v22, %s2190_s27  ;;  %545 = vrot.lane.b32.xlu0 %v470_v34, %s2190_s27  ;;  %v302_v22 = vrot.slane %v2424_v55, 1  ;;  %v349_v34 = vrot.slane %v215_v8, 1  ;;  %v3160_v8 = vrot.slane %v2448_v20, 2 }
  0x33   : > { %v2478_v18 = vsel %vm275_vm3, %v3153_v27, %v349_v34  ;;  %v305_v34 = vsel %vm275_vm3, %v302_v22, %v304_v23  ;;  %v303_v27 = vsel %vm275_vm3, %v301_v30, %v302_v22  ;;  %v704_v23 = vrot.slane %v221_v57, 1  ;;  %v2514_v30 = vld [vmem:[%s2237_s25 + $0x90] sm:$0xff] }
  0x34   : > { %v3163_v22 = vrot.slane %v2472_v3, 2  ;;  %v306_v16 = vrot.slane %v2514_v30, 1 }
  0x35   : > { %374 = vrot.lane.b32.xlu1 %v300_v61, %s2189_s26  ;;  %372 = vrot.lane.b32.xlu0 %v298_v0, %s2189_s26  ;;  %v3157_v61 = vrot.slane %v2448_v20, 1  ;;  %v479_v0 = vrot.slane %v2424_v55, 2 }
  0x37   : > { %v2498_v44 = vsel %vm275_vm3, %v3157_v61, %v354_v12  ;;  %v715_v12 = vrot.slane %v221_v57, 2  ;;  %v2520_v61 = vsel %vm275_vm3, %v3161_v56, %v704_v23  ;;  %v3166_v23 = vrot.slane %v2502_v37, 2 }
  0x38   : > { %v480_v56 = vsel %vm452_vm4, %v478_v28, %v479_v0 }
  0x39   : > { %551 = vrot.lane.b32.xlu1 %v477_v42, %s2190_s27  ;;  %549 = vrot.lane.b32.xlu0 %v475_v50, %s2190_s27  ;;  %v2510_v42 = vsel %vm452_vm4, %v3160_v8, %v531_v51  ;;  %v307_v50 = vrot.slane %v2483_v43, 1  ;;  %v482_v51 = vsel %vm452_vm4, %v479_v0, %v481_v53  ;;  %v309_v8 = vrot.slane %v191_v36, 1 }
  0x3a   : > { %v2529_v57 = vsel %vm452_vm4, %v3163_v22, %v715_v12  ;;  %v1307_v53 = vrot.slane %v224_v41, 2  ;;  %v484_v12 = vrot.slane %v2483_v43, 2  ;;  %v486_v22 = vrot.slane %v191_v36, 2  ;;  %v194_v41 = vld [vmem:[%s2237_s25 + $0xb8] sm:$0x3] }
  0x3b   : > { %v310_v0 = vsel %vm275_vm3, %v307_v50, %v309_v8  ;;  %v308_v28 = vsel %vm275_vm3, %v306_v16, %v307_v50 }
  0x3c   : > { %v487_v8 = vsel %vm452_vm4, %v484_v12, %v486_v22 }
  0x3d   : > { %378 = vrot.lane.b32.xlu1 %v305_v34, %s2189_s26  ;;  %376 = vrot.lane.b32.xlu0 %v303_v27, %s2189_s26  ;;  %v2537_v27 = vsel %vm275_vm3, %v3164_v25, %v1296_v21  ;;  %v2542_v34 = vsel %vm452_vm4, %v3166_v23, %v1307_v53  ;;  %v483_v21 = vrot.slane %v2514_v30, 2  ;;  %v2551_v25 = vld [vmem:[%s2237_s25 + $0xb0] sm:$0xff]  ;;  %v314_v53 = vrot.slane %v194_v41, 1 }
  0x3e   : > { %v312_v16 = vrot.slane %v2551_v25, 1  ;;  %v311_v23 = vrot.slane %v2555_v4, 1 }
  0x3f   : > { %v485_v50 = vsel %vm452_vm4, %v483_v21, %v484_v12  ;;  %v488_v12 = vrot.slane %v2555_v4, 2  ;;  %v2581_v21 = vld [vmem:[%s2237_s25 + $0xc0] sm:$0xff] }
  0x40   : > { %v313_v22 = vsel %vm275_vm3, %v311_v23, %v312_v16 }
  0x41   : > { %555 = vrot.lane.b32.xlu1 %v482_v51, %s2190_s27  ;;  %553 = vrot.lane.b32.xlu0 %v480_v56, %s2190_s27  ;;  %v1787_v51 = vld [vmem:[%s3147_s1 + $0x20] sm:$0xff]  ;;  %v1788_v56 = vld [vmem:[%s3147_s1 + $0x28] sm:$0xf] }
  0x42   : > { %v2566_v36 = vpack.c.bf16 %v1788_v56, %v1787_v51  ;;  %v491_v51 = vrot.slane %v194_v41, 2  ;;  %v494_v41 = vrot.slane %v2314_v46, 2 }
  0x44   : > { %2098 = vmatprep.subr.msk.bf16.mxu0 %vm2239_vm2, %v2566_v36 }
  0x45   : > { %382 = vrot.lane.b32.xlu1 %v310_v0, %s2189_s26  ;;  %380 = vrot.lane.b32.xlu0 %v308_v28, %s2189_s26  ;;  %v489_v0 = vrot.slane %v2551_v25, 2  ;;  %v315_v28 = vsel %vm275_vm3, %v312_v16, %v314_v53  ;;  %v496_v16 = vrot.slane %v2320_v48, 2  ;;  %v493_v53 = vrot.slane %v2581_v21, 2 }
  0x47   : > { %v492_v56 = vsel %vm452_vm4, %v489_v0, %v491_v51 }
  0x49   : > { %559 = vrot.lane.b32.xlu1 %v487_v8, %s2190_s27  ;;  %557 = vrot.lane.b32.xlu0 %v485_v50, %s2190_s27  ;;  %v490_v8 = vsel %vm452_vm4, %v488_v12, %v489_v0  ;;  %v316_v50 = vrot.slane %v2581_v21, 1  ;;  %v497_v0 = vsel %vm452_vm4, %v494_v41, %v496_v16  ;;  %v3169_v12 = vrot.slane %v2323_v49, 2 }
  0x4b   : > { %v318_v23 = vsel %vm275_vm3, %v316_v50, %v317_v52 }
  0x4d   : > { %386 = vrot.lane.b32.xlu1 %v315_v28, %s2189_s26  ;;  %384 = vrot.lane.b32.xlu0 %v313_v22, %s2189_s26  ;;  %v2597_v28 = vld [vmem:[%s2237_s25 + $0xd8] sm:$0xff]  ;;  %v495_v22 = vsel %vm452_vm4, %v493_v53, %v494_v41  ;;  %v3171_v41 = vrot.slane %v2336_v59, 2  ;;  %v3172_v53 = vrot.slane %v2356_v10, 1 }
  0x4e   : > { %v321_v52 = vrot.slane %v2597_v28, 1  ;;  %v498_v51 = vrot.slane %v2597_v28, 2 }
  0x50   : > { %v323_v48 = vsel %vm275_vm3, %v321_v52, %v322_v58  ;;  %v3170_v58 = vrot.slane %v2336_v59, 1  ;;  %v3173_v52 = vrot.slane %v2356_v10, 2 }
  0x51   : > { %563 = vrot.lane.b32.xlu1 %v492_v56, %s2190_s27  ;;  %561 = vrot.lane.b32.xlu0 %v490_v8, %s2190_s27  ;;  %v500_v56 = vsel %vm452_vm4, %v498_v51, %v3169_v12  ;;  %v3174_v51 = vrot.slane %v2380_v26, 1 }
  0x55   : > { %390 = vrot.lane.b32.xlu1 %v2345_v63, %s2189_s26  ;;  %388 = vrot.lane.b32.xlu0 %v318_v23, %s2189_s26  ;;  %v2612_v63 = vld [vmem:[%s2237_s25 + $0xf0] sm:$0xff]  ;;  %v2629_v23 = vld [vmem:[%s2237_s25 + $0x108] sm:$0xff] }
  0x56   : > { %v326_v8 = vrot.slane %v2612_v63, 1  ;;  %v331_v16 = vrot.slane %v2629_v23, 1 }
  0x58   : > { %v328_v50 = vsel %vm275_vm3, %v326_v8, %v3170_v58  ;;  %v3175_v8 = vrot.slane %v2380_v26, 2 }
  0x59   : > { %567 = vrot.lane.b32.xlu1 %v497_v0, %s2190_s27  ;;  %565 = vrot.lane.b32.xlu0 %v495_v22, %s2190_s27  ;;  %v333_v0 = vsel %vm275_vm3, %v331_v16, %v3172_v53  ;;  %v2646_v22 = vld [vmem:[%s2237_s25 + $0x120] sm:$0xff]  ;;  %v3178_v53 = vrot.slane %v2428_v60, 1 }
  0x5d   : > { %394 = vrot.lane.b32.xlu1 %v2366_v15, %s2189_s26  ;;  %392 = vrot.lane.b32.xlu0 %v323_v48, %s2189_s26  ;;  %v503_v15 = vrot.slane %v2612_v63, 2  ;;  %v336_v48 = vrot.slane %v2646_v22, 1 }
  0x5f   : > { %v338_v12 = vsel %vm275_vm3, %v336_v48, %v3174_v51 }
  0x61   : > { %571 = vrot.lane.b32.xlu1 %v2373_v19, %s2190_s27  ;;  %569 = vrot.lane.b32.xlu0 %v500_v56, %s2190_s27  ;;  %v505_v19 = vsel %vm452_vm4, %v503_v15, %v3171_v41  ;;  %v2663_v56 = vld [vmem:[%s2237_s25 + $0x138] sm:$0xff]  ;;  %v2680_v41 = vld [vmem:[%s2237_s25 + $0x150] sm:$0xff] }
  0x62   : > { %v341_v58 = vrot.slane %v2663_v56, 1 }
  0x65   : > { %398 = vrot.lane.b32.xlu1 %v2389_v29, %s2189_s26  ;;  %396 = vrot.lane.b32.xlu0 %v328_v50, %s2189_s26  ;;  %v508_v29 = vrot.slane %v2629_v23, 2  ;;  %v3176_v50 = vrot.slane %v2400_v38, 1 }
  0x67   : > { %v343_v15 = vsel %vm275_vm3, %v341_v58, %v3176_v50  ;;  %v2714_v58 = vld [vmem:[%s2237_s25 + $0x180] sm:$0xff] }
  0x69   : > { %575 = vrot.lane.b32.xlu1 %v2396_v35, %s2190_s27  ;;  %573 = vrot.lane.b32.xlu0 %v505_v19, %s2190_s27  ;;  %v510_v35 = vsel %vm452_vm4, %v508_v29, %v3173_v52  ;;  %v3177_v19 = vrot.slane %v2400_v38, 2  ;;  %v2697_v29 = vld [vmem:[%s2237_s25 + $0x168] sm:$0xff]  ;;  %v3179_v52 = vrot.slane %v2428_v60, 2 }
  0x6d   : > { %402 = vrot.lane.b32.xlu1 %v2405_v39, %s2189_s26  ;;  %400 = vrot.lane.b32.xlu0 %v333_v0, %s2189_s26  ;;  %v513_v39 = vrot.slane %v2646_v22, 2 }
  0x71   : > { %579 = vrot.lane.b32.xlu1 %v2416_v45, %s2190_s27  ;;  %577 = vrot.lane.b32.xlu0 %v510_v35, %s2190_s27  ;;  %v515_v45 = vsel %vm452_vm4, %v513_v39, %v3175_v8  ;;  %v351_v35 = vrot.slane %v2697_v29, 1 }
  0x75   : > { %406 = vrot.lane.b32.xlu1 %v2438_v2, %s2189_s26  ;;  %404 = vrot.lane.b32.xlu0 %v338_v12, %s2189_s26  ;;  %v518_v2 = vrot.slane %v2663_v56, 2  ;;  %v3180_v12 = vrot.slane %v2448_v20, 1 }
  0x77   : > { %v520_v16 = vsel %vm452_vm4, %v518_v2, %v3177_v19  ;;  %v353_v39 = vsel %vm275_vm3, %v351_v35, %v3180_v12  ;;  %v2748_v12 = vld [vmem:[%s2237_s25 + $0x198] sm:$0xff] }
  0x79   : > { %583 = vrot.lane.b32.xlu1 %v2444_v11, %s2190_s27  ;;  %581 = vrot.lane.b32.xlu0 %v515_v45, %s2190_s27  ;;  %v346_v11 = vrot.slane %v2680_v41, 1 }
  0x7b   : > { %v348_v0 = vsel %vm275_vm3, %v346_v11, %v3178_v53 }
  0x7d   : > { %410 = vrot.lane.b32.xlu1 %v2455_v24, %s2189_s26  ;;  %408 = vrot.lane.b32.xlu0 %v343_v15, %s2189_s26  ;;  %v523_v24 = vrot.slane %v2680_v41, 2  ;;  %v701_v15 = vrot.slane %v2714_v58, 1 }
  0x81   : > { %587 = vrot.lane.b32.xlu1 %v2465_v32, %s2190_s27  ;;  %585 = vrot.lane.b32.xlu0 %v520_v16, %s2190_s27  ;;  %v525_v32 = vsel %vm452_vm4, %v523_v24, %v3179_v52 }
  0x85   : > { %414 = vrot.lane.b32.xlu1 %v2478_v18, %s2189_s26  ;;  %412 = vrot.lane.b32.xlu0 %v348_v0, %s2189_s26  ;;  %v528_v18 = vrot.slane %v2697_v29, 2  ;;  %v712_v0 = vrot.slane %v2714_v58, 2 }
  0x87   : > { %v359_v48 = vpop.permute.xlu1 %358  ;;  %v357_v51 = vpop.permute.xlu0 %356 }
  0x88   : > { %v630_v2 = vsel %vm629_vm5, %v2250_v9, %v357_v51  ;;  %v3182_v9 = vrot.slane %v2472_v3, 1  ;;  %v631_v24 = vsel %vm629_vm5, %v2246_v7, %v359_v48  ;;  %v3183_v7 = vrot.slane %v2472_v3, 2 }
  0x89   : > { %591 = vrot.lane.b32.xlu1 %v2488_v54, %s2190_s27  ;;  %589 = vrot.lane.b32.xlu0 %v525_v32, %s2190_s27  ;;  %v3181_v54 = vrot.slane %v2448_v20, 2 }
  0x8b   : > { %v363_v8 = vpop.permute.xlu1 %362  ;;  %v361_v45 = vpop.permute.xlu0 %360  ;;  %v530_v50 = vsel %vm452_vm4, %v528_v18, %v3181_v54 }
  0x8c   : > { %v632_v19 = vsel %vm629_vm5, %v2267_v17, %v361_v45  ;;  %v703_v17 = vsel %vm275_vm3, %v701_v15, %v3182_v9  ;;  %v633_v52 = vsel %vm629_vm5, %v2257_v13, %v363_v8  ;;  %v714_v13 = vsel %vm452_vm4, %v712_v0, %v3183_v7 }
  0x8d   : > { %418 = vrot.lane.b32.xlu1 %v2498_v44, %s2189_s26  ;;  %416 = vrot.lane.b32.xlu0 %v353_v39, %s2189_s26  ;;  %v3185_v15 = vrot.slane %v2502_v37, 2 }
  0x8f   : > { %v538_v16 = vpop.permute.xlu1 %537  ;;  %v534_v11 = vpop.permute.xlu0 %533 }
  0x90   : > { %v665_v44 = vsel %vm662_vm6, %v632_v19, %v538_v16  ;;  %v663_v53 = vsel %vm662_vm6, %v630_v2, %v534_v11 }
  0x91   : > { %595 = vrot.lane.b32.xlu1 %v2510_v42, %s2190_s27  ;;  %593 = vrot.lane.b32.xlu0 %v530_v50, %s2190_s27  ;;  %v1304_v50 = vrot.slane %v2748_v12, 2 }
  0x92   : > { %1932 = vmatprep.mubr.msk.f32.mxu1 %vm727_vm7, %v665_v44  ;;  %1984 = vmatprep.mubr.msk.f32.mxu0 %vm727_vm7, %v663_v53 }
  0x93   : > { %v540_v32 = vpop.permute.xlu1 %539  ;;  %v536_v42 = vpop.permute.xlu0 %535  ;;  %v1306_v2 = vsel %vm452_vm4, %v1304_v50, %v3185_v15 }
  0x94   : > { %v666_v35 = vsel %vm662_vm6, %v633_v52, %v540_v32  ;;  %v664_v51 = vsel %vm662_vm6, %v631_v24, %v536_v42 }
  0x95   : > { %708 = vrot.lane.b32.xlu1 %v2520_v61, %s2189_s26  ;;  %706 = vrot.lane.b32.xlu0 %v703_v17, %s2189_s26  ;;  %v1293_v61 = vrot.slane %v2748_v12, 1 }
  0x96   : > { %1933 = vmatmul.mubr.msk.f32.vlgmr.msra.gmra.mrb[0].mxu1 %vm727_vm7, %v666_v35  ;;  %1985 = vmatmul.mubr.msk.f32.vlgmr.msra.gmra.mrb[0].mxu0 %vm727_vm7, %v664_v51 }
  0x97   : > { %1987 = vmatprep.mubr.msk.f32.mxu0 %vm727_vm7, %v665_v44  ;;  %v367_v48 = vpop.permute.xlu1 %366  ;;  %v365_v39 = vpop.permute.xlu0 %364  ;;  %2101 = vmatpush3.bf16.msk.msra.mxu0 %vm2239_vm2, %v2566_v36 }
  0x98   : > { %2103 = vmatpush3.bf16.msk.msra.mxu1 %vm2239_vm2, %v2243_v6  ;;  %v635_v18 = vsel %vm629_vm5, %v2291_v31, %v367_v48  ;;  %v634_v8 = vsel %vm629_vm5, %v2295_v33, %v365_v39  ;;  %v3184_v6 = vrot.slane %v2502_v37, 1 }
  0x99   : > { %719 = vrot.lane.b32.xlu1 %v2529_v57, %s2190_s27  ;;  %717 = vrot.lane.b32.xlu0 %v714_v13, %s2190_s27 }
  0x9a   : > { %1988 = vmatmul.mubr.msk.f32.gmra.mrb[2].mxu0 %vm727_vm7, %v666_v35  ;;  %v1295_v57 = vsel %vm275_vm3, %v1293_v61, %v3184_v6 }
  0x9b   : > { %v544_v36 = vpop.permute.xlu1 %543  ;;  %v542_v45 = vpop.permute.xlu0 %541 }
  0x9c   : > { %v2772_v54 = vsel %vm662_vm6, %v635_v18, %v544_v36  ;;  %v2775_v5 = vsel %vm662_vm6, %v634_v8, %v542_v45 }
  0x9d   : > { %1935 = vmatprep.mubr.msk.f32.mxu1 %vm727_vm7, %v2775_v5  ;;  %1990 = vmatprep.mubr.msk.f32.mxu0 %vm727_vm7, %v2775_v5 }
  0x9e   : > { %1936 = vmatmul.mubr.msk.f32.gmra.mrb[2].mxu1 %vm727_vm7, %v2772_v54  ;;  %1991 = vmatmul.mubr.msk.f32.gmra.mrb[4].mxu0 %vm727_vm7, %v2772_v54 }
  0x9f   : > { %v371_v31 = vpop.permute.xlu1 %370  ;;  %v369_v33 = vpop.permute.xlu0 %368  ;;  %1298 = vrot.lane.b32.xlu0 %v1295_v57, %s2189_s26  ;;  %1300 = vrot.lane.b32.xlu1 %v2537_v27, %s2189_s26 }
  0xa0   : > { %v637_v19 = vsel %vm629_vm5, %v2307_v40, %v371_v31  ;;  %v636_v16 = vsel %vm629_vm5, %v2317_v47, %v369_v33 }
  0xa3   : > { %v548_v11 = vpop.permute.xlu1 %547  ;;  %v546_v44 = vpop.permute.xlu0 %545  ;;  %1309 = vrot.lane.b32.xlu0 %v1306_v2, %s2190_s27  ;;  %1311 = vrot.lane.b32.xlu1 %v2542_v34, %s2190_s27 }
  0xa4   : > { %v2803_v53 = vsel %vm662_vm6, %v637_v19, %v548_v11  ;;  %v669_v27 = vsel %vm662_vm6, %v636_v16, %v546_v44 }
  0xa5   : > { %1938 = vmatprep.mubr.msk.f32.mxu1 %vm727_vm7, %v669_v27  ;;  %1993 = vmatprep.mubr.msk.f32.mxu0 %vm727_vm7, %v669_v27 }
  0xa6   : > { %1939 = vmatmul.mubr.msk.f32.gmra.mrb[4].mxu1 %vm727_vm7, %v2803_v53  ;;  %1994 = vmatmul.mubr.msk.f32.gmra.mrb[6].mxu0 %vm727_vm7, %v2803_v53 }
  0xa7   : > { %v375_v40 = vpop.permute.xlu1 %374  ;;  %v373_v47 = vpop.permute.xlu0 %372 }
  0xa8   : > { %v639_v34 = vsel %vm629_vm5, %v2340_v62, %v375_v40  ;;  %v638_v9 = vsel %vm629_vm5, %v2361_v14, %v373_v47 }
  0xab   : > { %v552_v17 = vpop.permute.xlu1 %551  ;;  %v550_v0 = vpop.permute.xlu0 %549 }
  0xac   : > { %v672_v24 = vsel %vm662_vm6, %v639_v34, %v552_v17  ;;  %v671_v52 = vsel %vm662_vm6, %v638_v9, %v550_v0 }
  0xad   : > { %1941 = vmatprep.mubr.msk.f32.mxu1 %vm727_vm7, %v671_v52  ;;  %1996 = vmatprep.mubr.msk.f32.mxu0 %vm727_vm7, %v671_v52 }
  0xae   : > { %1942 = vmatmul.mubr.msk.f32.gmra.mrb[6].mxu1 %vm727_vm7, %v672_v24  ;;  %1997 = vmatmul.mubr.msk.f32.gmra.mrb[8].mxu0 %vm727_vm7, %v672_v24 }
  0xaf   : > { %v379_v32 = vpop.permute.xlu1 %378  ;;  %v377_v42 = vpop.permute.xlu0 %376 }
  0xb0   : > { %v641_v62 = vsel %vm629_vm5, %v2424_v55, %v379_v32  ;;  %v640_v14 = vsel %vm629_vm5, %v2433_v1, %v377_v42 }
  0xb3   : > { %v556_v35 = vpop.permute.xlu1 %555  ;;  %v554_v51 = vpop.permute.xlu0 %553 }
  0xb4   : > { %v674_v7 = vsel %vm662_vm6, %v641_v62, %v556_v35  ;;  %v673_v13 = vsel %vm662_vm6, %v640_v14, %v554_v51 }
  0xb5   : > { %1944 = vmatprep.mubr.msk.f32.mxu1 %vm727_vm7, %v673_v13  ;;  %1999 = vmatprep.mubr.msk.f32.mxu0 %vm727_vm7, %v673_v13 }
  0xb6   : > { %1945 = vmatmul.mubr.msk.f32.gmra.mrb[8].mxu1 %vm727_vm7, %v674_v7  ;;  %2000 = vmatmul.mubr.msk.f32.gmra.mrb[10].mxu0 %vm727_vm7, %v674_v7 }
  0xb7   : > { %v383_v48 = vpop.permute.xlu1 %382  ;;  %v381_v39 = vpop.permute.xlu0 %380 }
  0xb8   : > { %v643_v55 = vsel %vm629_vm5, %v2483_v43, %v383_v48  ;;  %v642_v1 = vsel %vm629_vm5, %v2514_v30, %v381_v39 }
  0xbb   : > { %v560_v61 = vpop.permute.xlu1 %559  ;;  %v558_v18 = vpop.permute.xlu0 %557 }
  0xbc   : > { %v676_v8 = vsel %vm662_vm6, %v643_v55, %v560_v61  ;;  %v675_v36 = vsel %vm662_vm6, %v642_v1, %v558_v18 }
  0xbd   : > { %1947 = vmatprep.mubr.msk.f32.mxu1 %vm727_vm7, %v675_v36  ;;  %2002 = vmatprep.mubr.msk.f32.mxu0 %vm727_vm7, %v675_v36 }
  0xbe   : > { %1948 = vmatmul.mubr.msk.f32.gmra.mrb[10].mxu1 %vm727_vm7, %v676_v8  ;;  %2003 = vmatmul.mubr.msk.f32.gmra.mrb[12].mxu0 %vm727_vm7, %v676_v8 }
  0xbf   : > { %v387_v45 = vpop.permute.xlu1 %386  ;;  %v385_v6 = vpop.permute.xlu0 %384 }
  0xc0   : > { %v645_v43 = vsel %vm629_vm5, %v2551_v25, %v387_v45  ;;  %v644_v30 = vsel %vm629_vm5, %v2555_v4, %v385_v6 }
  0xc3   : > { %v564_v57 = vpop.permute.xlu1 %563  ;;  %v562_v50 = vpop.permute.xlu0 %561 }
  0xc4   : > { %v678_v31 = vsel %vm662_vm6, %v645_v43, %v564_v57  ;;  %v677_v33 = vsel %vm662_vm6, %v644_v30, %v562_v50 }
  0xc5   : > { %1950 = vmatprep.mubr.msk.f32.mxu1 %vm727_vm7, %v677_v33  ;;  %2005 = vmatprep.mubr.msk.f32.mxu0 %vm727_vm7, %v677_v33 }
  0xc6   : > { %1951 = vmatmul.mubr.msk.f32.gmra.mrb[12].mxu1 %vm727_vm7, %v678_v31  ;;  %2006 = vmatmul.mubr.msk.f32.gmra.mrb[14].mxu0 %vm727_vm7, %v678_v31 }
  0xc7   : > { %v391_v15 = vpop.permute.xlu1 %390  ;;  %2036 = vmatprep.mubr.msk.f32.mxu0 %vm727_vm7, %v2775_v5  ;;  %v389_v25 = vpop.permute.xlu0 %388 }
  0xc8   : > { %v647_v4 = vsel %vm629_vm5, %v2314_v46, %v391_v15  ;;  %v646_v2 = vsel %vm629_vm5, %v2581_v21, %v389_v25 }
  0xca   : > { %2037 = vmatmul.mubr.msk.f32.vlgmr.msra.gmra.mrb[0].mxu0 %vm727_vm7, %v2772_v54 }
  0xcb   : > { %v568_v19 = vpop.permute.xlu1 %567  ;;  %2039 = vmatprep.mubr.msk.f32.mxu0 %vm727_vm7, %v669_v27  ;;  %v566_v16 = vpop.permute.xlu0 %565 }
  0xcc   : > { %v2862_v11 = vsel %vm662_vm6, %v647_v4, %v568_v19  ;;  %v2865_v44 = vsel %vm662_vm6, %v646_v2, %v566_v16 }
  0xcd   : > { %1953 = vmatprep.mubr.msk.f32.mxu1 %vm727_vm7, %v2865_v44 }
  0xce   : > { %1954 = vmatmul.mubr.msk.f32.gmra.mrb[14].mxu1 %vm727_vm7, %v2862_v11  ;;  %2040 = vmatmul.mubr.msk.f32.gmra.mrb[2].mxu0 %vm727_vm7, %v2803_v53 }
  0xcf   : > { %v395_v46 = vpop.permute.xlu1 %394  ;;  %2042 = vmatprep.mubr.msk.f32.mxu0 %vm727_vm7, %v671_v52  ;;  %v393_v21 = vpop.permute.xlu0 %392 }
  0xd0   : > { %v649_v54 = vsel %vm629_vm5, %v2323_v49, %v395_v46  ;;  %v648_v5 = vsel %vm629_vm5, %v2597_v28, %v393_v21 }
  0xd2   : > { %2043 = vmatmul.mubr.msk.f32.gmra.mrb[4].mxu0 %vm727_vm7, %v672_v24 }
  0xd3   : > { %v572_v27 = vpop.permute.xlu1 %571  ;;  %2045 = vmatprep.mubr.msk.f32.mxu0 %vm727_vm7, %v673_v13  ;;  %v570_v40 = vpop.permute.xlu0 %569 }
  0xd4   : > { %v2881_v47 = vsel %vm662_vm6, %v649_v54, %v572_v27  ;;  %v2884_v53 = vsel %vm662_vm6, %v648_v5, %v570_v40 }
  0xd5   : > { %1956 = vmatprep.mubr.msk.f32.mxu1 %vm727_vm7, %v2884_v53 }
  0xd6   : > { %1957 = vmatmul.mubr.msk.f32.gmra.mrb[16].mxu1 %vm727_vm7, %v2881_v47  ;;  %2046 = vmatmul.mubr.msk.f32.gmra.mrb[6].mxu0 %vm727_vm7, %v674_v7 }
  0xd7   : > { %v399_v49 = vpop.permute.xlu1 %398  ;;  %2048 = vmatprep.mubr.msk.f32.mxu0 %vm727_vm7, %v675_v36  ;;  %v397_v28 = vpop.permute.xlu0 %396 }
  0xd8   : > { %v651_v34 = vsel %vm629_vm5, %v2336_v59, %v399_v49  ;;  %v650_v9 = vsel %vm629_vm5, %v2612_v63, %v397_v28 }
  0xda   : > { %2049 = vmatmul.mubr.msk.f32.gmra.mrb[8].mxu0 %vm727_vm7, %v676_v8 }
  0xdb   : > { %v576_v17 = vpop.permute.xlu1 %575  ;;  %2051 = vmatprep.mubr.msk.f32.mxu0 %vm727_vm7, %v677_v33  ;;  %v574_v0 = vpop.permute.xlu0 %573 }
  0xdc   : > { %v2899_v24 = vsel %vm662_vm6, %v651_v34, %v576_v17  ;;  %v2902_v52 = vsel %vm662_vm6, %v650_v9, %v574_v0 }
  0xdd   : > { %1959 = vmatprep.mubr.msk.f32.mxu1 %vm727_vm7, %v2902_v52 }
  0xde   : > { %1960 = vmatmul.mubr.msk.f32.gmra.mrb[18].mxu1 %vm727_vm7, %v2899_v24  ;;  %2052 = vmatmul.mubr.msk.f32.gmra.mrb[10].mxu0 %vm727_vm7, %v678_v31 }
  0xdf   : > { %v403_v59 = vpop.permute.xlu1 %402  ;;  %2054 = vmatprep.mubr.msk.f32.mxu0 %vm727_vm7, %v2865_v44  ;;  %v401_v63 = vpop.permute.xlu0 %400 }
  0xe0   : > { %v653_v32 = vsel %vm629_vm5, %v2356_v10, %v403_v59  ;;  %v652_v42 = vsel %vm629_vm5, %v2629_v23, %v401_v63 }
  0xe2   : > { %2055 = vmatmul.mubr.msk.f32.gmra.mrb[12].mxu0 %vm727_vm7, %v2862_v11 }
  0xe3   : > { %v580_v62 = vpop.permute.xlu1 %579  ;;  %2057 = vmatprep.mubr.msk.f32.mxu0 %vm727_vm7, %v2884_v53  ;;  %v578_v14 = vpop.permute.xlu0 %577 }
  0xe4   : > { %v2920_v35 = vsel %vm662_vm6, %v653_v32, %v580_v62  ;;  %v2923_v51 = vsel %vm662_vm6, %v652_v42, %v578_v14 }
  0xe5   : > { %1962 = vmatprep.mubr.msk.f32.mxu1 %vm727_vm7, %v2923_v51 }
  0xe6   : > { %1963 = vmatmul.mubr.msk.f32.gmra.mrb[20].mxu1 %vm727_vm7, %v2920_v35  ;;  %2058 = vmatmul.mubr.msk.f32.gmra.mrb[14].mxu0 %vm727_vm7, %v2881_v47 }
  0xe7   : > { %v407_v10 = vpop.permute.xlu1 %406  ;;  %2060 = vmatprep.mubr.msk.f32.mxu0 %vm727_vm7, %v2902_v52  ;;  %v405_v23 = vpop.permute.xlu0 %404 }
  0xe8   : > { %v655_v7 = vsel %vm629_vm5, %v2380_v26, %v407_v10  ;;  %v654_v13 = vsel %vm629_vm5, %v2646_v22, %v405_v23 }
  0xea   : > { %2061 = vmatmul.mubr.msk.f32.gmra.mrb[16].mxu0 %vm727_vm7, %v2899_v24 }
  0xeb   : > { %v584_v48 = vpop.permute.xlu1 %583  ;;  %2063 = vmatprep.mubr.msk.f32.mxu0 %vm727_vm7, %v2923_v51  ;;  %v582_v39 = vpop.permute.xlu0 %581 }
  0xec   : > { %v2942_v55 = vsel %vm662_vm6, %v655_v7, %v584_v48  ;;  %v2945_v1 = vsel %vm662_vm6, %v654_v13, %v582_v39 }
  0xed   : > { %1965 = vmatprep.mubr.msk.f32.mxu1 %vm727_vm7, %v2945_v1 }
  0xee   : > { %1966 = vmatmul.mubr.msk.f32.gmra.mrb[22].mxu1 %vm727_vm7, %v2942_v55  ;;  %2064 = vmatmul.mubr.msk.f32.gmra.mrb[18].mxu0 %vm727_vm7, %v2920_v35 }
  0xef   : > { %v411_v26 = vpop.permute.xlu1 %410  ;;  %2066 = vmatprep.mubr.msk.f32.mxu0 %vm727_vm7, %v2945_v1  ;;  %v409_v22 = vpop.permute.xlu0 %408 }
  0xf0   : > { %v657_v61 = vsel %vm629_vm5, %v2400_v38, %v411_v26  ;;  %v656_v18 = vsel %vm629_vm5, %v2663_v56, %v409_v22 }
  0xf2   : > { %2067 = vmatmul.mubr.msk.f32.gmra.mrb[20].mxu0 %vm727_vm7, %v2942_v55 }
  0xf3   : > { %v588_v8 = vpop.permute.xlu1 %587  ;;  %v586_v36 = vpop.permute.xlu0 %585 }
  0xf4   : > { %v2962_v45 = vsel %vm662_vm6, %v657_v61, %v588_v8  ;;  %v689_v6 = vsel %vm662_vm6, %v656_v18, %v586_v36 }
  0xf5   : > { %1968 = vmatprep.mubr.msk.f32.mxu1 %vm727_vm7, %v689_v6  ;;  %2069 = vmatprep.mubr.msk.f32.mxu0 %vm727_vm7, %v689_v6 }
  0xf6   : > { %1969 = vmatmul.mubr.msk.f32.gmra.mrb[24].mxu1 %vm727_vm7, %v2962_v45  ;;  %2070 = vmatmul.mubr.msk.f32.gmra.mrb[22].mxu0 %vm727_vm7, %v2962_v45 }
  0xf7   : > { %v415_v38 = vpop.permute.xlu1 %414  ;;  %v413_v43 = vpop.permute.xlu0 %412 }
  0xf8   : > { %v659_v56 = vsel %vm629_vm5, %v2428_v60, %v415_v38  ;;  %v658_v30 = vsel %vm629_vm5, %v2680_v41, %v413_v43 }
  0xfb   : > { %v592_v57 = vpop.permute.xlu1 %591  ;;  %v590_v50 = vpop.permute.xlu0 %589 }
  0xfc   : > { %v692_v31 = vsel %vm662_vm6, %v659_v56, %v592_v57  ;;  %v691_v33 = vsel %vm662_vm6, %v658_v30, %v590_v50 }
  0xfd   : > { %1971 = vmatprep.mubr.msk.f32.mxu1 %vm727_vm7, %v691_v33  ;;  %2072 = vmatprep.mubr.msk.f32.mxu0 %vm727_vm7, %v691_v33 }
  0xfe   : > { %1972 = vmatmul.mubr.msk.f32.gmra.mrb[26].mxu1 %vm727_vm7, %v692_v31  ;;  %2073 = vmatmul.mubr.msk.f32.gmra.mrb[24].mxu0 %vm727_vm7, %v692_v31 }
  0xff   : > { %v419_v15 = vpop.permute.xlu1 %418  ;;  %v417_v25 = vpop.permute.xlu0 %416 }
 0x100   : > { %v661_v60 = vsel %vm629_vm5, %v2448_v20, %v419_v15  ;;  %v660_v41 = vsel %vm629_vm5, %v2697_v29, %v417_v25 }
 0x103   : > { %v596_v4 = vpop.permute.xlu1 %595  ;;  %v594_v2 = vpop.permute.xlu0 %593 }
 0x104   : > { %v694_v19 = vsel %vm662_vm6, %v661_v60, %v596_v4  ;;  %v693_v16 = vsel %vm662_vm6, %v660_v41, %v594_v2 }
 0x105   : > { %1974 = vmatprep.mubr.msk.f32.mxu1 %vm727_vm7, %v693_v16  ;;  %2075 = vmatprep.mubr.msk.f32.mxu0 %vm727_vm7, %v693_v16 }
 0x106   : > { %1975 = vmatmul.mubr.msk.f32.gmra.mrb[28].mxu1 %vm727_vm7, %v694_v19  ;;  %2076 = vmatmul.mubr.msk.f32.gmra.mrb[26].mxu0 %vm727_vm7, %v694_v19 }
 0x107   : > { %v709_v46 = vpop.permute.xlu1 %708  ;;  %v707_v21 = vpop.permute.xlu0 %706 }
 0x108   : > { %v724_v20 = vsel %vm629_vm5, %v2472_v3, %v709_v46  ;;  %v723_v29 = vsel %vm629_vm5, %v2714_v58, %v707_v21 }
 0x10b   : > { %v720_v54 = vpop.permute.xlu1 %719  ;;  %v718_v5 = vpop.permute.xlu0 %717 }
 0x10c   : > { %v726_v27 = vsel %vm662_vm6, %v724_v20, %v720_v54  ;;  %v725_v40 = vsel %vm662_vm6, %v723_v29, %v718_v5 }
 0x10d   : > { %1977 = vmatprep.mubr.msk.f32.mxu1 %vm727_vm7, %v725_v40  ;;  %2078 = vmatprep.mubr.msk.f32.mxu0 %vm727_vm7, %v725_v40 }
 0x10e   : > { %1978 = vmatmul.mubr.msk.f32.gmra.mrb[30].mxu1 %vm727_vm7, %v726_v27  ;;  %2079 = vmatmul.mubr.msk.f32.gmra.mrb[28].mxu0 %vm727_vm7, %v726_v27 }
 0x10f   : > { %2008 = vmatprep.mubr.msk.f32.mxu1 %vm727_vm7, %v2865_v44 }
 0x111   : > { %v1299_v3 = vpop.permute.xlu0 %1298  ;;  %v1301_v49 = vpop.permute.xlu1 %1300 }
 0x112   : > { %2009 = vmatmul.mubr.msk.f32.vlgmr.msra.gmra.mrb[16].mxu1 %vm727_vm7, %v2862_v11  ;;  %v1315_v58 = vsel %vm629_vm5, %v2748_v12, %v1299_v3  ;;  %v1316_v28 = vsel %vm629_vm5, %v2502_v37, %v1301_v49 }
 0x113   : > { %2011 = vmatprep.mubr.msk.f32.mxu1 %vm727_vm7, %v2884_v53 }
 0x115   : > { %v1310_v34 = vpop.permute.xlu0 %1309  ;;  %v1312_v9 = vpop.permute.xlu1 %1311 }
 0x116   : > { %2012 = vmatmul.mubr.msk.f32.gmra.mrb[18].mxu1 %vm727_vm7, %v2881_v47  ;;  %v1317_v44 = vsel %vm662_vm6, %v1315_v58, %v1310_v34  ;;  %v1318_v17 = vsel %vm662_vm6, %v1316_v28, %v1312_v9 }
 0x117   : > { %2014 = vmatprep.mubr.msk.f32.mxu1 %vm727_vm7, %v2902_v52  ;;  %2081 = vmatprep.mubr.msk.f32.mxu0 %vm727_vm7, %v1317_v44 }
 0x118   : > { %2082 = vmatmul.mubr.msk.f32.gmra.mrb[30].mxu0 %vm727_vm7, %v1318_v17 }
 0x11a   : > { %2015 = vmatmul.mubr.msk.f32.gmra.mrb[20].mxu1 %vm727_vm7, %v2899_v24 }
 0x11b   : > { %2017 = vmatprep.mubr.msk.f32.mxu1 %vm727_vm7, %v2923_v51  ;;  %v3040_v51 = vld [vmem:[%s3148_s2] ss:$0 sm:$0xff] }
 0x11e   : > { %2018 = vmatmul.mubr.msk.f32.gmra.mrb[22].mxu1 %vm727_vm7, %v2920_v35 }
 0x11f   : > { %2020 = vmatprep.mubr.msk.f32.mxu1 %vm727_vm7, %v2945_v1 }
 0x122   : > { %2021 = vmatmul.mubr.msk.f32.gmra.mrb[24].mxu1 %vm727_vm7, %v2942_v55 }
 0x123   : > { %2023 = vmatprep.mubr.msk.f32.mxu1 %vm727_vm7, %v689_v6 }
 0x126   : > { %2024 = vmatmul.mubr.msk.f32.gmra.mrb[26].mxu1 %vm727_vm7, %v2962_v45 }
 0x127   : > { %2026 = vmatprep.mubr.msk.f32.mxu1 %vm727_vm7, %v691_v33 }
 0x12a   : > { %2027 = vmatmul.mubr.msk.f32.gmra.mrb[28].mxu1 %vm727_vm7, %v692_v31 }
 0x12b   : > { %2029 = vmatprep.mubr.msk.f32.mxu1 %vm727_vm7, %v693_v16 }
 0x12e   : > { %2030 = vmatmul.mubr.msk.f32.gmra.mrb[30].mxu1 %vm727_vm7, %v694_v19 }
 0x169   : > { %v1934_v37 = vpop.f32.mrb[0].mxu1 }
 0x16a   : > { %v894_v12 = vpop.f32.mrb[1].mxu1 }
 0x171   : > { %v1937_v11 = vpop.f32.mrb[2].mxu1 }
 0x172   : > { %v904_v47 = vpop.f32.mrb[3].mxu1 }
 0x179   : > { %v1940_v53 = vpop.f32.mrb[4].mxu1 }
 0x17a   : > { %v914_v0 = vpop.f32.mrb[5].mxu1 }
 0x181   : > { %v1943_v24 = vpop.f32.mrb[6].mxu1 }
 0x182   : > { %v924_v52 = vpop.f32.mrb[7].mxu1 }
 0x189   : > { %v1946_v59 = vpop.f32.mrb[8].mxu1 }
 0x18a   : > { %v934_v63 = vpop.f32.mrb[9].mxu1 }
 0x191   : > { %v1949_v32 = vpop.f32.mrb[10].mxu1 }
 0x192   : > { %v944_v42 = vpop.f32.mrb[11].mxu1 }
 0x199   : > { %v1952_v62 = vpop.f32.mrb[12].mxu1 }
 0x19a   : > { %v954_v14 = vpop.f32.mrb[13].mxu1 }
 0x19d   : > { %v2038_v35 = vpop.f32.mrb[0].mxu0 }
 0x19e   : > { %v2104_v10 = vadd.f32 %v2038_v35, %v1934_v37  ;;  %v1394_v23 = vpop.f32.mrb[1].mxu0 }
 0x19f   : > { %v2105_v7 = vadd.f32 %v1394_v23, %v894_v12 }
 0x1a0   : > { %v1593_v13 = vadd.f32 %v2104_v10, %v3040_v51 }
 0x1a1   : > { %v1592_v48 = vadd.f32 %v2105_v7, %v3040_v51  ;;  %v1955_v39 = vpop.f32.mrb[14].mxu1  ;;  %v2041_v55 = vpop.f32.mrb[2].mxu0 }
 0x1a2   : > { %1625 = vst.msk [vmem:[%s3045_s10 + $0x8] sm:$0xff] %vm662_vm6, %v1593_v13  ;;  %v2106_v1 = vadd.f32 %v2041_v55, %v1937_v11  ;;  %v964_v26 = vpop.f32.mrb[15].mxu1  ;;  %v1404_v22 = vpop.f32.mrb[3].mxu0 }
 0x1a3   : > { %1624 = vst.msk [vmem:[%s3045_s10] sm:$0xff] %vm662_vm6, %v1592_v48  ;;  %v2107_v61 = vadd.f32 %v1404_v22, %v904_v47 }
 0x1a4   : > { %v1595_v18 = vadd.f32 %v2106_v1, %v3040_v51 }
 0x1a5   : > { %v1594_v8 = vadd.f32 %v2107_v61, %v3040_v51  ;;  %v2044_v36 = vpop.f32.mrb[4].mxu0 }
 0x1a6   : > { %1627 = vst.msk [vmem:[%s3045_s10 + $0x18] sm:$0xff] %vm662_vm6, %v1595_v18  ;;  %v2108_v45 = vadd.f32 %v2044_v36, %v1940_v53  ;;  %v1414_v6 = vpop.f32.mrb[5].mxu0 }
 0x1a7   : > { %1626 = vst.msk [vmem:[%s3045_s10 + $0x10] sm:$0xff] %vm662_vm6, %v1594_v8  ;;  %v2109_v38 = vadd.f32 %v1414_v6, %v914_v0 }
 0x1a8   : > { %v1597_v43 = vadd.f32 %v2108_v45, %v3040_v51 }
 0x1a9   : > { %v1596_v56 = vadd.f32 %v2109_v38, %v3040_v51  ;;  %v2047_v30 = vpop.f32.mrb[6].mxu0 }
 0x1aa   : > { %1629 = vst.msk [vmem:[%s3045_s10 + $0x28] sm:$0xff] %vm662_vm6, %v1597_v43  ;;  %v2110_v57 = vadd.f32 %v2047_v30, %v1943_v24  ;;  %v1424_v50 = vpop.f32.mrb[7].mxu0 }
 0x1ab   : > { %1628 = vst.msk [vmem:[%s3045_s10 + $0x20] sm:$0xff] %vm662_vm6, %v1596_v56  ;;  %v2111_v31 = vadd.f32 %v1424_v50, %v924_v52 }
 0x1ac   : > { %v1599_v33 = vadd.f32 %v2110_v57, %v3040_v51 }
 0x1ad   : > { %v1598_v15 = vadd.f32 %v2111_v31, %v3040_v51  ;;  %v2050_v25 = vpop.f32.mrb[8].mxu0 }
 0x1ae   : > { %1631 = vst.msk [vmem:[%s3045_s10 + $0x38] sm:$0xff] %vm662_vm6, %v1599_v33  ;;  %v2112_v60 = vadd.f32 %v2050_v25, %v1946_v59  ;;  %v1434_v41 = vpop.f32.mrb[9].mxu0 }
 0x1af   : > { %1630 = vst.msk [vmem:[%s3045_s10 + $0x30] sm:$0xff] %vm662_vm6, %v1598_v15  ;;  %v2113_v4 = vadd.f32 %v1434_v41, %v934_v63 }
 0x1b0   : > { %v1601_v2 = vadd.f32 %v2112_v60, %v3040_v51 }
 0x1b1   : > { %v1600_v19 = vadd.f32 %v2113_v4, %v3040_v51  ;;  %v2053_v16 = vpop.f32.mrb[10].mxu0 }
 0x1b2   : > { %1633 = vst.msk [vmem:[%s3045_s10 + $0x48] sm:$0xff] %vm662_vm6, %v1601_v2  ;;  %v2114_v46 = vadd.f32 %v2053_v16, %v1949_v32  ;;  %v1444_v21 = vpop.f32.mrb[11].mxu0 }
 0x1b3   : > { %1632 = vst.msk [vmem:[%s3045_s10 + $0x40] sm:$0xff] %vm662_vm6, %v1600_v19  ;;  %v2115_v20 = vadd.f32 %v1444_v21, %v944_v42 }
 0x1b4   : > { %v1603_v29 = vadd.f32 %v2114_v46, %v3040_v51 }
 0x1b5   : > { %v1602_v54 = vadd.f32 %v2115_v20, %v3040_v51  ;;  %v2056_v5 = vpop.f32.mrb[12].mxu0 }
 0x1b6   : > { %1635 = vst.msk [vmem:[%s3045_s10 + $0x58] sm:$0xff] %vm662_vm6, %v1603_v29  ;;  %v2116_v27 = vadd.f32 %v2056_v5, %v1952_v62  ;;  %v1454_v40 = vpop.f32.mrb[13].mxu0 }
 0x1b7   : > { %1634 = vst.msk [vmem:[%s3045_s10 + $0x50] sm:$0xff] %vm662_vm6, %v1602_v54  ;;  %v2117_v3 = vadd.f32 %v1454_v40, %v954_v14 }
 0x1b8   : > { %v1605_v49 = vadd.f32 %v2116_v27, %v3040_v51 }
 0x1b9   : > { %v1604_v58 = vadd.f32 %v2117_v3, %v3040_v51  ;;  %v2059_v28 = vpop.f32.mrb[14].mxu0 }
 0x1ba   : > { %1637 = vst.msk [vmem:[%s3045_s10 + $0x68] sm:$0xff] %vm662_vm6, %v1605_v49  ;;  %v2118_v34 = vadd.f32 %v2059_v28, %v1955_v39  ;;  %v1464_v9 = vpop.f32.mrb[15].mxu0 }
 0x1bb   : > { %1636 = vst.msk [vmem:[%s3045_s10 + $0x60] sm:$0xff] %vm662_vm6, %v1604_v58  ;;  %v2119_v44 = vadd.f32 %v1464_v9, %v964_v26 }
 0x1bc   : > { %v1607_v17 = vadd.f32 %v2118_v34, %v3040_v51 }
 0x1bd   : > { %v1606_v37 = vadd.f32 %v2119_v44, %v3040_v51  ;;  %v2062_v12 = vpop.f32.mrb[16].mxu0 }
 0x1be   : > { %1639 = vst.msk [vmem:[%s3045_s10 + $0x78] sm:$0xff] %vm662_vm6, %v1607_v17  ;;  %v1474_v11 = vpop.f32.mrb[17].mxu0 }
 0x1bf   : > { %1638 = vst.msk [vmem:[%s3045_s10 + $0x70] sm:$0xff] %vm662_vm6, %v1606_v37 }
 0x1c1   : > { %v2065_v47 = vpop.f32.mrb[18].mxu0 }
 0x1c2   : > { %v1484_v53 = vpop.f32.mrb[19].mxu0 }
 0x1c5   : > { %v2068_v0 = vpop.f32.mrb[20].mxu0 }
 0x1c6   : > { %v1494_v24 = vpop.f32.mrb[21].mxu0 }
 0x1c9   : > { %v2071_v52 = vpop.f32.mrb[22].mxu0 }
 0x1ca   : > { %v1504_v59 = vpop.f32.mrb[23].mxu0 }
 0x1d1   : > { %v2074_v63 = vpop.f32.mrb[24].mxu0 }
 0x1d2   : > { %v1514_v32 = vpop.f32.mrb[25].mxu0 }
 0x1d9   : > { %v2077_v42 = vpop.f32.mrb[26].mxu0 }
 0x1da   : > { %v1524_v62 = vpop.f32.mrb[27].mxu0 }
 0x1e1   : > { %v2080_v14 = vpop.f32.mrb[28].mxu0 }
 0x1e2   : > { %v1534_v35 = vpop.f32.mrb[29].mxu0 }
 0x1e5   : > { %v2010_v10 = vpop.f32.mrb[16].mxu1 }
 0x1e6   : > { %v2120_v23 = vadd.f32 %v2062_v12, %v2010_v10  ;;  %v1208_v7 = vpop.f32.mrb[17].mxu1 }
 0x1e7   : > { %v2121_v13 = vadd.f32 %v1474_v11, %v1208_v7 }
 0x1e8   : > { %v1609_v48 = vadd.f32 %v2120_v23, %v3040_v51 }
 0x1e9   : > { %v1608_v39 = vadd.f32 %v2121_v13, %v3040_v51  ;;  %v2013_v55 = vpop.f32.mrb[18].mxu1 }
 0x1ea   : > { %1641 = vst.msk [vmem:[%s3045_s10 + $0x88] sm:$0xff] %vm662_vm6, %v1609_v48  ;;  %v2122_v1 = vadd.f32 %v2065_v47, %v2013_v55  ;;  %v1218_v26 = vpop.f32.mrb[19].mxu1 }
 0x1eb   : > { %1640 = vst.msk [vmem:[%s3045_s10 + $0x80] sm:$0xff] %vm662_vm6, %v1608_v39  ;;  %v2123_v22 = vadd.f32 %v1484_v53, %v1218_v26  ;;  %v2083_v61 = vpop.f32.mrb[30].mxu0 }
 0x1ec   : > { %v1611_v18 = vadd.f32 %v2122_v1, %v3040_v51  ;;  %v1544_v8 = vpop.f32.mrb[31].mxu0 }
 0x1ed   : > { %v1610_v36 = vadd.f32 %v2123_v22, %v3040_v51  ;;  %v2016_v45 = vpop.f32.mrb[20].mxu1 }
 0x1ee   : > { %1643 = vst.msk [vmem:[%s3045_s10 + $0x98] sm:$0xff] %vm662_vm6, %v1611_v18  ;;  %v2124_v6 = vadd.f32 %v2068_v0, %v2016_v45  ;;  %v1228_v38 = vpop.f32.mrb[21].mxu1 }
 0x1ef   : > { %1642 = vst.msk [vmem:[%s3045_s10 + $0x90] sm:$0xff] %vm662_vm6, %v1610_v36  ;;  %v2125_v43 = vadd.f32 %v1494_v24, %v1228_v38 }
 0x1f0   : > { %v1613_v56 = vadd.f32 %v2124_v6, %v3040_v51 }
 0x1f1   : > { %v1612_v30 = vadd.f32 %v2125_v43, %v3040_v51  ;;  %v2019_v57 = vpop.f32.mrb[22].mxu1 }
 0x1f2   : > { %1645 = vst.msk [vmem:[%s3045_s10 + $0xa8] sm:$0xff] %vm662_vm6, %v1613_v56  ;;  %v2126_v50 = vadd.f32 %v2071_v52, %v2019_v57  ;;  %v1238_v31 = vpop.f32.mrb[23].mxu1 }
 0x1f3   : > { %1644 = vst.msk [vmem:[%s3045_s10 + $0xa0] sm:$0xff] %vm662_vm6, %v1612_v30  ;;  %v2127_v33 = vadd.f32 %v1504_v59, %v1238_v31 }
 0x1f4   : > { %v1615_v15 = vadd.f32 %v2126_v50, %v3040_v51 }
 0x1f5   : > { %v1614_v25 = vadd.f32 %v2127_v33, %v3040_v51  ;;  %v2022_v60 = vpop.f32.mrb[24].mxu1 }
 0x1f6   : > { %1647 = vst.msk [vmem:[%s3045_s10 + $0xb8] sm:$0xff] %vm662_vm6, %v1615_v15  ;;  %v2128_v41 = vadd.f32 %v2074_v63, %v2022_v60  ;;  %v1248_v4 = vpop.f32.mrb[25].mxu1 }
 0x1f7   : > { %1646 = vst.msk [vmem:[%s3045_s10 + $0xb0] sm:$0xff] %vm662_vm6, %v1614_v25  ;;  %v2129_v2 = vadd.f32 %v1514_v32, %v1248_v4 }
 0x1f8   : > { %v1617_v19 = vadd.f32 %v2128_v41, %v3040_v51 }
 0x1f9   : > { %v1616_v16 = vadd.f32 %v2129_v2, %v3040_v51  ;;  %v2025_v46 = vpop.f32.mrb[26].mxu1 }
 0x1fa   : > { %1649 = vst.msk [vmem:[%s3045_s10 + $0xc8] sm:$0xff] %vm662_vm6, %v1617_v19  ;;  %v2130_v21 = vadd.f32 %v2077_v42, %v2025_v46  ;;  %v1258_v20 = vpop.f32.mrb[27].mxu1 }
 0x1fb   : > { %1648 = vst.msk [vmem:[%s3045_s10 + $0xc0] sm:$0xff] %vm662_vm6, %v1616_v16  ;;  %v2131_v29 = vadd.f32 %v1524_v62, %v1258_v20 }
 0x1fc   : > { %v1619_v54 = vadd.f32 %v2130_v21, %v3040_v51 }
 0x1fd   : > { %v1618_v5 = vadd.f32 %v2131_v29, %v3040_v51  ;;  %v2028_v27 = vpop.f32.mrb[28].mxu1 }
 0x1fe   : > { %1651 = vst.msk [vmem:[%s3045_s10 + $0xd8] sm:$0xff] %vm662_vm6, %v1619_v54  ;;  %v2132_v40 = vadd.f32 %v2080_v14, %v2028_v27  ;;  %v1268_v3 = vpop.f32.mrb[29].mxu1 }
 0x1ff   : > { %1650 = vst.msk [vmem:[%s3045_s10 + $0xd0] sm:$0xff] %vm662_vm6, %v1618_v5  ;;  %v2133_v49 = vadd.f32 %v1534_v35, %v1268_v3 }
 0x200   : > { %v1621_v58 = vadd.f32 %v2132_v40, %v3040_v51 }
 0x201   : > { %v1620_v28 = vadd.f32 %v2133_v49, %v3040_v51  ;;  %v2031_v34 = vpop.f32.mrb[30].mxu1 }
 0x202   : > { %1653 = vst.msk [vmem:[%s3045_s10 + $0xe8] sm:$0xff] %vm662_vm6, %v1621_v58  ;;  %v2134_v9 = vadd.f32 %v2083_v61, %v2031_v34  ;;  %v1278_v44 = vpop.f32.mrb[31].mxu1 }
 0x203   : > { %1652 = vst.msk [vmem:[%s3045_s10 + $0xe0] sm:$0xff] %vm662_vm6, %v1620_v28  ;;  %v2135_v17 = vadd.f32 %v1544_v8, %v1278_v44 }
 0x204   : > { %v1623_v37 = vadd.f32 %v2134_v9, %v3040_v51 }
 0x205   : > { %v1622_v12 = vadd.f32 %v2135_v17, %v3040_v51 }
 0x206   : > { %1655 = vst.msk [vmem:[%s3045_s10 + $0xf8] sm:$0xff] %vm662_vm6, %v1623_v37 }
 0x207   : > { %1654 = vst.msk [vmem:[%s3045_s10 + $0xf0] sm:$0xff] %vm662_vm6, %v1622_v12 }
 0x208 PF: > { %s13_s12 = sadd.s32 1, %s2186_s12  }
 0x209   : > { %p10_p4 = scmp.ge.s32.totalorder %s13_s12, 4  }
 0x20b   :  { %12 = sbr.rel (!%p10_p4) target bundleno = 1 (0x1), region = 64 }

</bundles_post_ra>
